<compile_context>
chip_gen: v6e
topology: v6e:2x2x1
jax: 0.10.0
libtpu: 0.0.40
codegen_flags: <defaults>
</compile_context>

<pallas_src>
import functools

import jax
import jax.numpy as jnp
from jax.experimental import pallas as pl
from jax.experimental.pallas import tpu as pltpu


# ---------------------------------------------------------------------------
# Parameter construction (plain JAX glue, mirrors compute_offset_scale_shift)
# ---------------------------------------------------------------------------
def compute_offset_scale_shift(zero_point, scale, num_bits_scale=1):
    """Deterministic synthetic version of the TI helper.

    Decomposes the affine requant  y = (x + offset) * mult * shift_mult
    with an integer multiplier and a power-of-two shift.
    """
    # TODO(synk): exact compute_offset_scale_shift source not provided; this uses the
    # standard fixed-point decomposition (mult = round(scale * 2^shift), shift_mult = 2^-shift).
    shift = 8 * num_bits_scale
    offset = jnp.asarray(zero_point, jnp.float32)
    mult = jnp.round(jnp.asarray(scale, jnp.float32) * (2.0 ** shift))
    shift_mult = jnp.asarray(2.0 ** (-shift), jnp.float32)
    return offset, mult, shift_mult


# ---------------------------------------------------------------------------
# Pallas kernel: fused add + offset/scale + floor/round + clamp(+relu+clip)
# ---------------------------------------------------------------------------
def _add_oss_relu_kernel(x_ref, y_ref, off_ref, scale_ref, o_ref, *,
                         lo, hi, use_floor):
    # out = x + y ; z = (out + offset) * (mult * shift_mult)
    z = (x_ref[...] + y_ref[...] + off_ref[...]) * scale_ref[...]
    z = jnp.floor(z) if use_floor else jnp.round(z)
    # Folded: clamp(quant_min, quant_max) [+ ReLU + Hardtanh]  ->  single clip.
    o_ref[...] = jnp.clip(z, lo, hi)


def _pick_tile(dim, target, align):
    """Largest legal block extent <= target (full dim is always legal)."""
    if dim <= target:
        return dim
    return (target // align) * align


def add_relu_block(x_nchw, y_nchw, offset, mult, shift_mult, *,
                   min_relu_clip, max_relu_clip, with_relu, use_floor=True,
                   row_tile_target=512, lane_tile_target=512):
    """Wrapper: NCHW in / NCHW out, fused elementwise hot path in Pallas."""
    N, C, H, W = x_nchw.shape
    M, L = N * C, H * W

    if with_relu:
        # clamp(-max, max) -> relu -> hardtanh(min_clip, max_clip) folds to:
        lo = max(0.0, float(min_relu_clip))
        hi = float(max_relu_clip)
    else:
        lo, hi = -128.0, 127.0

    # Zero-cost reshapes: NCHW -> (N*C, H*W).
    x2 = x_nchw.reshape(M, L).astype(jnp.float32)
    y2 = y_nchw.reshape(M, L).astype(jnp.float32)

    # Per-channel params -> per-row (N*C, 1) columns. shift_mult is a power of
    # two, so pre-multiplying it into mult is bit-exact in f32.
    off_c = jnp.broadcast_to(jnp.ravel(jnp.asarray(offset, jnp.float32)), (C,))
    mult_c = jnp.broadcast_to(jnp.ravel(jnp.asarray(mult, jnp.float32)), (C,))
    sm_c = jnp.broadcast_to(jnp.ravel(jnp.asarray(shift_mult, jnp.float32)), (C,))
    off_col = jnp.tile(off_c, N).reshape(M, 1)
    scale_col = jnp.tile(mult_c * sm_c, N).reshape(M, 1)

    # Tile sizes: 512x512 f32 tiles -> 1 MiB/block, ~6 MiB total double-buffered
    # (fits v5e's 16 MiB scoped default; well past the ~85% HBM-roofline knee).
    tm = _pick_tile(M, row_tile_target, 8)
    tl = _pick_tile(L, lane_tile_target, 128)
    grid = (pl.cdiv(M, tm), pl.cdiv(L, tl))

    data_spec = pl.BlockSpec((tm, tl), lambda i, j: (i, j))
    col_spec = pl.BlockSpec((tm, 1), lambda i, j: (i, 0))

    kernel = functools.partial(_add_oss_relu_kernel,
                               lo=lo, hi=hi, use_floor=use_floor)

    out2 = pl.pallas_call(
        kernel,
        out_shape=jax.ShapeDtypeStruct((M, L), jnp.float32),
        grid=grid,
        in_specs=[data_spec, data_spec, col_spec, col_spec],
        out_specs=pl.BlockSpec((tm, tl), lambda i, j: (i, j)),
        compiler_params=pltpu.CompilerParams(
            dimension_semantics=("parallel", "parallel")),
    )(x2, y2, off_col, scale_col)

    # (N*C, H*W) -> NCHW (zero-cost reshape, no transpose).
    return out2.reshape(N, C, H, W)


# ---------------------------------------------------------------------------
# Pure-JAX reference for verification (mirrors the PyTorch module exactly)
# ---------------------------------------------------------------------------
def add_relu_block_ref(x, y, offset, mult, shift_mult, *,
                       min_relu_clip, max_relu_clip, with_relu, use_floor=True):
    if with_relu:
        quant_min, quant_max = -float(max_relu_clip), float(max_relu_clip)
    else:
        quant_min, quant_max = -128.0, 127.0
    off = jnp.reshape(offset, (1, -1, 1, 1))
    mlt = jnp.reshape(mult, (1, -1, 1, 1))
    sm = jnp.reshape(shift_mult, (1, -1, 1, 1))
    out = x + y
    z = (out + off) * mlt
    z = z * sm
    z = jnp.floor(z) if use_floor else jnp.round(z)
    z = jnp.clip(z, quant_min, quant_max)
    if with_relu:
        z = jnp.maximum(z, 0.0)
        z = jnp.clip(z, float(min_relu_clip), float(max_relu_clip))
    return z


if __name__ == "__main__":
    # Module hyper-params (deterministic, synthetic)
    min_relu_clip = 0.0
    max_relu_clip = 127.0
    with_relu = True
    num_bits_scale = 1
    zero_point = 3.0
    scale = 0.4375

    N, C, H, W = 2, 4, 16, 16
    offset_s, mult_s, shift_mult_s = compute_offset_scale_shift(
        zero_point, scale, num_bits_scale=num_bits_scale)
    # Per-channel buffers (shape (1,C,1,1) in the PyTorch module).
    offset = jnp.broadcast_to(offset_s, (C,))
    mult = jnp.broadcast_to(mult_s, (C,))
    shift_mult = jnp.broadcast_to(shift_mult_s, (C,))

    key = jax.random.PRNGKey(0)
    k1, k2 = jax.random.split(key)
    x = jnp.round(jax.random.uniform(k1, (N, C, H, W), jnp.float32,
                                     minval=-128.0, maxval=127.0))
    y = jnp.round(jax.random.uniform(k2, (N, C, H, W), jnp.float32,
                                     minval=-128.0, maxval=127.0))

    out = add_relu_block(x, y, offset, mult, shift_mult,
                         min_relu_clip=min_relu_clip,
                         max_relu_clip=max_relu_clip,
                         with_relu=with_relu)
    out = jax.block_until_ready(out)

    ref = add_relu_block_ref(x, y, offset, mult, shift_mult,
                             min_relu_clip=min_relu_clip,
                             max_relu_clip=max_relu_clip,
                             with_relu=with_relu)
    assert out.shape == (N, C, H, W)
    assert jnp.allclose(out, ref, atol=1e-5), "mismatch vs reference"
    print("KERNEL_OK")
</pallas_src>

<mosaic_0001>
module attributes {stable_mosaic.version = 11 : i64} {
  func.func @_add_oss_relu_kernel(%arg0: i32, %arg1: i32, %arg2: memref<8x256xf32, #tpu.memory_space<vmem>>, %arg3: memref<8x256xf32, #tpu.memory_space<vmem>>, %arg4: memref<8x1xf32, #tpu.memory_space<vmem>>, %arg5: memref<8x1xf32, #tpu.memory_space<vmem>>, %arg6: memref<8x256xf32, #tpu.memory_space<vmem>>) attributes {dimension_semantics = [#tpu.dimension_semantics<parallel>, #tpu.dimension_semantics<parallel>], iteration_bounds = array<i64: 1, 1>, scalar_prefetch = 0 : i64, scratch_operands = 0 : i64, tpu.core_type = #tpu.core_type<tc>, window_params = [{transform_indices = @transform_0, window_bounds = array<i64: 8, 256>}, {transform_indices = @transform_1, window_bounds = array<i64: 8, 256>}, {transform_indices = @transform_2, window_bounds = array<i64: 8, 1>}, {transform_indices = @transform_3, window_bounds = array<i64: 8, 1>}, {transform_indices = @transform_4, window_bounds = array<i64: 8, 256>}]} {
    %c0 = arith.constant 0 : index
    %c0_0 = arith.constant 0 : index
    %0 = vector.load %arg2[%c0, %c0_0] : memref<8x256xf32, #tpu.memory_space<vmem>>, vector<8x256xf32>
    %c0_1 = arith.constant 0 : index
    %c0_2 = arith.constant 0 : index
    %1 = vector.load %arg3[%c0_1, %c0_2] : memref<8x256xf32, #tpu.memory_space<vmem>>, vector<8x256xf32>
    %2 = arith.addf %0, %1 : vector<8x256xf32>
    %c0_3 = arith.constant 0 : index
    %c0_4 = arith.constant 0 : index
    %3 = vector.load %arg4[%c0_3, %c0_4] : memref<8x1xf32, #tpu.memory_space<vmem>>, vector<8x1xf32>
    %4 = vector.broadcast %3 : vector<8x1xf32> to vector<8x256xf32>
    %5 = arith.addf %2, %4 : vector<8x256xf32>
    %c0_5 = arith.constant 0 : index
    %c0_6 = arith.constant 0 : index
    %6 = vector.load %arg5[%c0_5, %c0_6] : memref<8x1xf32, #tpu.memory_space<vmem>>, vector<8x1xf32>
    %7 = vector.broadcast %6 : vector<8x1xf32> to vector<8x256xf32>
    %8 = arith.mulf %5, %7 : vector<8x256xf32>
    %9 = math.floor %8 : vector<8x256xf32>
    %cst = arith.constant 0.000000e+00 : f32
    %cst_7 = arith.constant 1.270000e+02 : f32
    %10 = vector.broadcast %cst : f32 to vector<8x256xf32>
    %11 = arith.maximumf %10, %9 : vector<8x256xf32>
    %12 = vector.broadcast %cst_7 : f32 to vector<8x256xf32>
    %13 = arith.minimumf %12, %11 : vector<8x256xf32>
    %c0_8 = arith.constant 0 : index
    %c0_9 = arith.constant 0 : index
    %14 = vector.load %arg6[%c0_8, %c0_9] : memref<8x256xf32, #tpu.memory_space<vmem>>, vector<8x256xf32>
    tpu.vector_store %arg6[%c0_8, %c0_9], %13 {strides = array<i32>} : memref<8x256xf32, #tpu.memory_space<vmem>>, vector<8x256xf32>,
    return
  }
  func.func @transform_0(%arg0: i32, %arg1: i32) -> (i32, i32) {
    %c0_i32 = arith.constant 0 : i32
    return %arg0, %arg1 : i32, i32
  }
  func.func @transform_1(%arg0: i32, %arg1: i32) -> (i32, i32) {
    %c0_i32 = arith.constant 0 : i32
    return %arg0, %arg1 : i32, i32
  }
  func.func @transform_2(%arg0: i32, %arg1: i32) -> (i32, i32) {
    %c0_i32 = arith.constant 0 : i32
    %c0_i32_0 = arith.constant 0 : i32
    return %arg0, %c0_i32 : i32, i32
  }
  func.func @transform_3(%arg0: i32, %arg1: i32) -> (i32, i32) {
    %c0_i32 = arith.constant 0 : i32
    %c0_i32_0 = arith.constant 0 : i32
    return %arg0, %c0_i32 : i32, i32
  }
  func.func @transform_4(%arg0: i32, %arg1: i32) -> (i32, i32) {
    %c0_i32 = arith.constant 0 : i32
    return %arg0, %arg1 : i32, i32
  }
}

</mosaic_0001>

<bundles_post_ra>
// kernel: tpu_custom_call.1
= control target key start
LH: loop header
LB: loop body
LE: loop exit
PB: predicated region body
PF: predicated region fallthrough
CT: control target
= control target key end

     0   :  { %9 = vsyncpa [#allocation3], 0  ;;  %s169_s0 = inlined_call_operand.vmem [shape: f32[8,256], index: 0, kind: input, shape index: {}]   ;;  %s170_s1 = inlined_call_operand.hbm [shape: f32[8,256], index: 1, kind: input, shape index: {}]   ;;  %s171_s2 = inlined_call_operand.vmem [shape: f32[8,1], index: 2, kind: input, shape index: {}]   ;;  %s172_s3 = inlined_call_operand.vmem [shape: f32[8,1], index: 3, kind: input, shape index: {}]   ;;  %s173_s4 = inlined_call_operand.hbm [shape: f32[8,256], index: 4, kind: output, shape index: {}]  }
   0x1   :  { %10 = vsyncpa [#allocation4], 0  ;;  %s123_s15 = smov [#allocation2]  }
   0x2   :  { %s19_s16 = sshll.u32 %s123_s15, 4  ;;  %s20_s16 = int_to_ptr.vmem [resolvable:$true] %s19_s16 }
   0x3   :  { %s87_s17 = scalar_lea.vmem %s20_s16, 256  ;;  %p92_p1 = scmp.lt.s32.totalorder %s20_s16, %s20_s16 }
   0x4   :  { %p88_p0 = scmp.ne.s32.totalorder %s20_s16, %s87_s17  ;;  %p93_p2 = scmp.lt.s32.totalorder %s87_s17, %s87_s17 }
   0x6   :  { %p94_p3 = por %p93_p2, %p92_p1 }
   0x8   :  { %p95_p4 = pnand %p94_p3, %p88_p0 }
   0xa   :  { %98 = shalt.err (!%p95_p4)
}
   0xb   :  { %22 = dma.hbm_to_vmem [thread:$0]  %s170_s1, 256, %s20_s16, [#allocation3]  }
   0xc   :  { %119 = dma.done.wait [#allocation3], 256  }
   0xd   :  { %120 = vsyncadd [#allocation3], 4294967040  ;;  %v124_v0 = vmov 0   ;;  %v36_v1 = vld [vmem:[%s171_s2] sm:$0xff]  ;;  %v31_v4 = vld [vmem:[%s169_s0 + $0x8] sm:$0xff]  ;;  %s125_s2 = smov [#allocation5]  }
   0xe   :  { %78 = vset.pattern.permute.xlu0 %v124_v0  ;;  %v44_v2 = vld [vmem:[%s172_s3] sm:$0xff]  ;;  %v33_v6 = vld [vmem:[#allocation2 + $0x8] sm:$0xff]  ;;  %s66_s3 = sshll.u32 %s125_s2, 4  ;;  %s67_s3 = int_to_ptr.vmem [resolvable:$true] %s66_s3 }
   0xf   :  { %39 = vperm.xlu0 %78, %v36_v1   ;;  %v30_v3 = vld [vmem:[%s169_s0] sm:$0xff]  ;;  %v35_v8 = vadd.f32 %v33_v6, %v31_v4  ;;  %s99_s0 = scalar_lea.vmem %s67_s3, 256  ;;  %p104_p6 = scmp.lt.s32.totalorder %s67_s3, %s67_s3 }
  0x10   :  { %v32_v5 = vld [vmem:[#allocation2] sm:$0xff]  ;;  %p100_p5 = scmp.ne.s32.totalorder %s67_s3, %s99_s0  ;;  %p105_p7 = scmp.lt.s32.totalorder %s99_s0, %s99_s0 }
  0x11   :  { %v34_v7 = vadd.f32 %v32_v5, %v30_v3 }
  0x12   :  { %p106_p8 = por %p105_p7, %p104_p6 }
  0x13   :  { %47 = vperm.xlu0 %78, %v44_v2  }
  0x14   :  { %p107_p9 = pnand %p106_p8, %p100_p5 }
  0x8a   :  { %v40_v9 = vpop.permute.xlu0 %39 }
  0x8b   :  { %v42_v10 = vadd.f32 %v40_v9, %v34_v7  ;;  %v43_v11 = vadd.f32 %v40_v9, %v35_v8 }
  0x8e   :  { %v48_v12 = vpop.permute.xlu0 %47 }
  0x8f   :  { %v50_v13 = vmul.f32 %v48_v12, %v42_v10  ;;  %v51_v14 = vmul.f32 %v48_v12, %v43_v11 }
  0x91   :  { %v52_v15 = vfloor.f32 %v50_v13  ;;  %v53_v16 = vfloor.f32 %v51_v14 }
  0x93   :  { %v54_v17 = vmax.f32 %v52_v15, 0.0  ;;  %v55_v18 = vmax.f32 %v53_v16, 0.0 }
  0x95   :  { %v56_v19 = vmin.f32 %v54_v17, 127.0  ;;  %v57_v20 = vmin.f32 %v55_v18, 127.0 }
  0x97   :  { %58 = vst [vmem:[#allocation5] sm:$0xff] %v56_v19  ;;  %59 = vst [vmem:[#allocation5 + $0x8] sm:$0xff] %v57_v20 }
  0x98   :  { %110 = shalt.err (!%p107_p9)
}
  0x99   :  { %69 = dma.vmem_to_hbm [thread:$0]  %s67_s3, 256, %s173_s4, [#allocation4]  }
  0x9a   :  { %121 = dma.done.wait [#allocation4], 256  }
  0x9b   :  { %122 = vsyncadd [#allocation4], 4294967040 }
  0x9c   :  { %73 = vsyncpa [#allocation3], 1 }
  0x9d   :  { %74 = vsyncpa [#allocation4], 1 }

</bundles_post_ra>
